<compile_context>
chip_gen: v6e
topology: v6e:2x2x1
jax: 0.10.0
libtpu: 0.0.40
codegen_flags: <defaults>
</compile_context>

<pallas_src>
import functools

import jax
import jax.numpy as jnp
from jax.experimental import pallas as pl
from jax.experimental.pallas import tpu as pltpu


# ----------------------------------------------------------------------------
# helpers
# ----------------------------------------------------------------------------
def _round_up(v, m):
    return ((v + m - 1) // m) * m


@functools.lru_cache(maxsize=None)
def _vmem_limit_bytes():
    """Generation-aware scoped-VMEM limit (~5/8 of physical, capped)."""
    cap = 64 * 1024 * 1024  # conservative default (v7x per-core VMEM)
    try:
        cap = int(pltpu.get_tpu_info().vmem_capacity_bytes)
    except Exception:
        pass
    return min((cap * 5) // 8, 96 * 1024 * 1024)


def _compiler_params(semantics):
    return pltpu.CompilerParams(
        dimension_semantics=semantics,
        vmem_limit_bytes=_vmem_limit_bytes(),
    )


def _pad2(a, rows, cols):
    r, c = a.shape
    if r == rows and c == cols:
        return a
    return jnp.pad(a, ((0, rows - r), (0, cols - c)))


def _to_bf16(v):
    return v if v.dtype == jnp.bfloat16 else v.astype(jnp.bfloat16)


# ----------------------------------------------------------------------------
# tiled K-reduction matmul: y = mix(act(x @ w + b))
# ----------------------------------------------------------------------------
def _matmul_kernel(*refs, has_bias, has_mix, act, sigma):
    x_ref, w_ref = refs[0], refs[1]
    pos = 2
    b_ref = mix_ref = None
    if has_bias:
        b_ref = refs[pos]
        pos += 1
    if has_mix:
        mix_ref = refs[pos]
        pos += 1
    o_ref, acc_ref = refs[pos], refs[pos + 1]

    @pl.when(pl.program_id(2) == 0)
    def _():
        acc_ref[...] = jnp.zeros_like(acc_ref)

    acc_ref[...] += jnp.dot(_to_bf16(x_ref[...]), _to_bf16(w_ref[...]),
                            preferred_element_type=jnp.float32)

    @pl.when(pl.program_id(2) == pl.num_programs(2) - 1)
    def _():
        y = acc_ref[...]
        if has_bias:
            y = y + b_ref[...]
        if act == "relu":
            y = jnp.maximum(y, 0.0)
        if has_mix:  # (1 - sigma) * relu(adj @ support) + sigma * tra
            y = (1.0 - sigma) * y + sigma * mix_ref[...].astype(jnp.float32)
        o_ref[...] = y.astype(o_ref.dtype)


def matmul(x, w, bias=None, act=None, *, mix_with=None, sigma=0.5,
           out_dtype=jnp.float32, tm=256, tn=512, tk=1024):
    """Tiled y = mix(act(x @ w + bias)) with f32 VMEM accumulation.

    Fixed tiles + cdiv grid; non-divisible dims are zero-padded once and the
    output sliced.  `mix_with` (out-tile shaped) is fused into the finalize
    step of the K reduction.
    """
    M, K = x.shape
    Kw, N = w.shape
    assert K == Kw, (x.shape, w.shape)

    tm = M if M <= tm else tm
    tn = N if N <= tn else tn
    tk = K if K <= tk else tk
    Mp, Np, Kp = _round_up(M, tm), _round_up(N, tn), _round_up(K, tk)

    args = [_pad2(x, Mp, Kp), _pad2(w, Kp, Np)]
    in_specs = [pl.BlockSpec((tm, tk), lambda i, j, k: (i, k)),
                pl.BlockSpec((tk, tn), lambda i, j, k: (k, j))]
    if bias is not None:
        args.append(_pad2(bias, 1, Np))
        in_specs.append(pl.BlockSpec((1, tn), lambda i, j, k: (0, j)))
    if mix_with is not None:
        assert mix_with.shape == (M, N)
        args.append(_pad2(mix_with, Mp, Np))
        in_specs.append(pl.BlockSpec((tm, tn), lambda i, j, k: (i, j)))

    cost = pl.CostEstimate(
        flops=2 * Mp * Np * Kp,
        transcendentals=0,
        bytes_accessed=int(Mp * Kp * jnp.dtype(x.dtype).itemsize
                           + Kp * Np * jnp.dtype(w.dtype).itemsize
                           + Mp * Np * jnp.dtype(out_dtype).itemsize),
    )

    kernel = functools.partial(_matmul_kernel, has_bias=bias is not None,
                               has_mix=mix_with is not None,
                               act=act, sigma=sigma)
    out = pl.pallas_call(
        kernel,
        out_shape=jax.ShapeDtypeStruct((Mp, Np), out_dtype),
        grid_spec=pltpu.PrefetchScalarGridSpec(
            num_scalar_prefetch=0,
            grid=(Mp // tm, Np // tn, Kp // tk),
            in_specs=in_specs,
            out_specs=pl.BlockSpec((tm, tn), lambda i, j, k: (i, j)),
            scratch_shapes=[pltpu.VMEM((tm, tn), jnp.float32)],
        ),
        compiler_params=_compiler_params(("parallel", "parallel", "arbitrary")),
        cost_estimate=cost,
    )(*args)
    if (Mp, Np) != (M, N):
        out = out[:M, :N]
    return out


# ----------------------------------------------------------------------------
# fused AE decoder: dec_1 -> dec_2 -> x_bar (intermediates stay in VMEM)
# ----------------------------------------------------------------------------
def _decoder_kernel(z_ref, w1_ref, b1_ref, w2_ref, b2_ref, w3_ref, b3_ref,
                    o_ref):
    h = jnp.dot(_to_bf16(z_ref[...]), _to_bf16(w1_ref[...]),
                preferred_element_type=jnp.float32) + b1_ref[...]
    h = jnp.maximum(h, 0.0)
    h = jnp.dot(_to_bf16(h), _to_bf16(w2_ref[...]),
                preferred_element_type=jnp.float32) + b2_ref[...]
    h = jnp.maximum(h, 0.0)
    o_ref[...] = (jnp.dot(_to_bf16(h), _to_bf16(w3_ref[...]),
                          preferred_element_type=jnp.float32)
                  + b3_ref[...]).astype(o_ref.dtype)


def decoder(z, w1, b1, w2, b2, w3, b3, *, tr=256):
    """AE decoder; fused when constants + tiles fit the per-generation VMEM
    budget, otherwise three tiled matmuls with bf16 intermediates."""
    M, n_z = z.shape
    n_in = w3.shape[1]
    tr = M if M <= tr else tr

    vmem_limit = _vmem_limit_bytes()
    const_bytes = sum(int(a.size) * jnp.dtype(a.dtype).itemsize
                      for a in (w1, b1, w2, b2, w3, b3))
    tile_bytes = tr * (n_z * 4 + w1.shape[1] * 4 + w2.shape[1] * 4 + n_in * 4)
    if 2 * const_bytes + 2 * tile_bytes > (vmem_limit * 3) // 4:
        h = matmul(z, w1, b1, act="relu", out_dtype=jnp.bfloat16)
        h = matmul(h, w2, b2, act="relu", out_dtype=jnp.bfloat16)
        return matmul(h, w3, b3, out_dtype=jnp.float32)

    Mp = _round_up(M, tr)
    zp = _pad2(z, Mp, n_z)

    def const(a):
        return pl.BlockSpec(a.shape, lambda i: (0, 0))

    out = pl.pallas_call(
        _decoder_kernel,
        out_shape=jax.ShapeDtypeStruct((Mp, n_in), jnp.float32),
        grid_spec=pltpu.PrefetchScalarGridSpec(
            num_scalar_prefetch=0,
            grid=(Mp // tr,),
            in_specs=[pl.BlockSpec((tr, n_z), lambda i: (i, 0)),
                      const(w1), const(b1), const(w2), const(b2),
                      const(w3), const(b3)],
            out_specs=pl.BlockSpec((tr, n_in), lambda i: (i, 0)),
        ),
        compiler_params=_compiler_params(("parallel",)),
    )(zp, w1, b1, w2, b2, w3, b3)
    return out[:M] if Mp != M else out


# ----------------------------------------------------------------------------
# attention fusion of the two views [h3, z]
# ----------------------------------------------------------------------------
def _attention_kernel(h3_ref, z_ref, w1_ref, b1_ref, w2_ref,
                      emb_ref, beta_ref):
    h3 = h3_ref[...]
    z = z_ref[...]
    w1 = _to_bf16(w1_ref[...])
    b1 = b1_ref[...]
    w2 = w2_ref[...]                                   # (1, hidden), f32

    # project([h3; z]) as two small dots against the resident w1 (no staging)
    t3 = jnp.tanh(jnp.dot(_to_bf16(h3), w1,
                          preferred_element_type=jnp.float32) + b1)
    tz = jnp.tanh(jnp.dot(_to_bf16(z), w1,
                          preferred_element_type=jnp.float32) + b1)

    # (hidden -> 1) projection as VPU multiply + lane reduction
    s3 = jnp.sum(t3 * w2, axis=-1, keepdims=True)      # (rows, 1)
    sz = jnp.sum(tz * w2, axis=-1, keepdims=True)

    # exact 2-way softmax over the view axis
    m = jnp.maximum(s3, sz)
    e3 = jnp.exp(s3 - m)
    ez = jnp.exp(sz - m)
    denom = e3 + ez
    beta3 = e3 / denom
    betaz = ez / denom

    emb_ref[...] = (beta3 * h3.astype(jnp.float32)
                    + betaz * z.astype(jnp.float32)).astype(emb_ref.dtype)
    col = jax.lax.broadcasted_iota(jnp.int32, (beta_ref.shape[0], 2), 1)
    beta_ref[...] = jnp.where(col == 0, beta3, betaz)


def attention(h3, z, w1, b1, w2_row, *, tr=512):
    N, n_z = h3.shape
    tr = N if N <= tr else tr
    Np = _round_up(N, tr)
    h3p = _pad2(h3, Np, n_z)
    zp = _pad2(z, Np, n_z)

    row_spec = pl.BlockSpec((tr, n_z), lambda i: (i, 0))

    def const(a):
        return pl.BlockSpec(a.shape, lambda i: (0, 0))

    emb, beta = pl.pallas_call(
        _attention_kernel,
        out_shape=(jax.ShapeDtypeStruct((Np, n_z), jnp.float32),
                   jax.ShapeDtypeStruct((Np, 2), jnp.float32)),
        grid_spec=pltpu.PrefetchScalarGridSpec(
            num_scalar_prefetch=0,
            grid=(Np // tr,),
            in_specs=[row_spec, row_spec, const(w1), const(b1), const(w2_row)],
            out_specs=(row_spec, pl.BlockSpec((tr, 2), lambda i: (i, 0))),
        ),
        compiler_params=_compiler_params(("parallel",)),
    )(h3p, zp, w1, b1, w2_row)
    if Np != N:
        emb, beta = emb[:N], beta[:N]
    return emb, beta


# ----------------------------------------------------------------------------
# DM_DDI forward
# ----------------------------------------------------------------------------
def dm_ddi_forward(params, x, adj, edge_array, labels):
    sigma = 0.5

    # Inputs feed the MXU repeatedly -> cast to bf16 once (not per k-step).
    x_bf = x.astype(jnp.bfloat16)
    adj_bf = adj.astype(jnp.bfloat16)

    # ---- AE encoder (tra1/tra2 kept in bf16 in HBM; z stays f32 for the
    #      attention / emb1 output path) ----
    tra1 = matmul(x_bf, params["enc1_w"], params["enc1_b"], act="relu",
                  out_dtype=jnp.bfloat16)
    tra2 = matmul(tra1, params["enc2_w"], params["enc2_b"], act="relu",
                  out_dtype=jnp.bfloat16)
    z = matmul(tra2, params["z_w"], params["z_b"], out_dtype=jnp.float32)

    x_bar = decoder(z, params["dec1_w"], params["dec1_b"],
                    params["dec2_w"], params["dec2_b"],
                    params["xbar_w"], params["xbar_b"])

    # ---- GNN stack: gnn_k(inp, adj) = relu(adj @ (inp @ Wk)); the sigma-mix
    #      with tra_k is fused into the finalize of the adj@support matmul so
    #      the mixed tensor is written once (bf16) and consumed once ----
    s1 = matmul(x_bf, params["gnn1_w"], out_dtype=jnp.bfloat16)
    mix1 = matmul(adj_bf, s1, act="relu", mix_with=tra1, sigma=sigma,
                  out_dtype=jnp.bfloat16)            # = (1-s)*h1 + s*tra1
    s2 = matmul(mix1, params["gnn2_w"], out_dtype=jnp.bfloat16)
    mix2 = matmul(adj_bf, s2, act="relu", mix_with=tra2, sigma=sigma,
                  out_dtype=jnp.bfloat16)            # = (1-s)*h2 + s*tra2
    s3 = matmul(mix2, params["gnn3_w"], out_dtype=jnp.bfloat16)
    h3 = matmul(adj_bf, s3, out_dtype=jnp.float32)   # gnn_3: active=False

    # ---- attention fusion of [h3, z] ----
    emb1, beta = attention(h3, z, params["att_w1"], params["att_b1"],
                           params["att_w2_row"])
    att1 = beta[:, :, None]                          # (N, 2, 1), torch layout

    # ---- combine_drugpairs(emb1, method_num=1) ----
    # TODO(synk): original loads (ddi_arr, label) from adj_file on disk; the
    # edge list / labels here are synthetic in-script inputs.
    # Gather + average left to XLA so it fuses with jnp.take (a per-pair
    # Pallas launch would be pure step overhead).
    num_pairs = edge_array.shape[0]
    num_train = int(num_pairs * 0.8)
    left = jnp.take(emb1, edge_array[:, 0], axis=0)
    right = jnp.take(emb1, edge_array[:, 1], axis=0)
    pairs = (left + right) * 0.5
    C1 = pairs[:num_train]
    C2 = pairs[num_train:]
    label_train_y = labels[:num_train]
    label_test_y = labels[num_train:]

    return emb1, att1, x_bar, C1, C2, label_train_y, label_test_y


# ----------------------------------------------------------------------------
# deterministic parameter / input construction
# ----------------------------------------------------------------------------
def xavier_normal(key, fan_in, fan_out):
    std = (2.0 / (fan_in + fan_out)) ** 0.5
    return std * jax.random.normal(key, (fan_in, fan_out), dtype=jnp.float32)


_BF16_KEYS = ("enc1_w", "enc2_w", "z_w", "dec1_w", "dec2_w", "xbar_w",
              "gnn1_w", "gnn2_w", "gnn3_w", "att_w1")


def make_params(key, n_input, n_enc_1, n_enc_2, n_z, att_hidden):
    keys = jax.random.split(key, 16)
    p = {}
    # AE (NOTE: original loads a pretrained checkpoint with dims 5824/2048/1024;
    # here we use small consistent dims).
    p["enc1_w"] = xavier_normal(keys[0], n_input, n_enc_1)
    p["enc1_b"] = jnp.zeros((1, n_enc_1), jnp.float32)
    p["enc2_w"] = xavier_normal(keys[1], n_enc_1, n_enc_2)
    p["enc2_b"] = jnp.zeros((1, n_enc_2), jnp.float32)
    p["z_w"] = xavier_normal(keys[2], n_enc_2, n_z)
    p["z_b"] = jnp.zeros((1, n_z), jnp.float32)
    p["dec1_w"] = xavier_normal(keys[3], n_z, n_enc_2)
    p["dec1_b"] = jnp.zeros((1, n_enc_2), jnp.float32)
    p["dec2_w"] = xavier_normal(keys[4], n_enc_2, n_enc_1)
    p["dec2_b"] = jnp.zeros((1, n_enc_1), jnp.float32)
    p["xbar_w"] = xavier_normal(keys[5], n_enc_1, n_input)
    p["xbar_b"] = jnp.zeros((1, n_input), jnp.float32)
    # GNN layers
    p["gnn1_w"] = xavier_normal(keys[6], n_input, n_enc_1)
    p["gnn2_w"] = xavier_normal(keys[7], n_enc_1, n_enc_2)
    p["gnn3_w"] = xavier_normal(keys[8], n_enc_2, n_z)
    # Attention: Linear(n_z, hidden) -> tanh -> Linear(hidden, 1, bias=False);
    # the second projection is stored as a (1, hidden) row for the in-kernel
    # multiply + lane reduction.
    p["att_w1"] = xavier_normal(keys[9], n_z, att_hidden)
    p["att_b1"] = jnp.zeros((1, att_hidden), jnp.float32)
    p["att_w2_row"] = xavier_normal(keys[10], 1, att_hidden)
    # TODO(synk): self.predict and cluster_layer exist in __init__ but are
    # unused in forward; omitted.
    return p


def cast_weights_bf16(params):
    # weights feed the MXU -> bf16; biases / att_w2_row stay f32 (VPU path).
    return {k: (v.astype(jnp.bfloat16) if k in _BF16_KEYS else v)
            for k, v in params.items()}


if __name__ == "__main__":
    # Small, consistent shapes (real model: n_input=5824, n_enc_1=2048, ...)
    N = 16          # number of drugs / graph nodes
    n_input = 64
    n_enc_1 = 32
    n_enc_2 = 32
    n_z = 16
    att_hidden = 128
    num_pairs = 20

    root = jax.random.PRNGKey(0)
    k_par, k_x, k_adj, k_edge, k_lab = jax.random.split(root, 5)

    params = cast_weights_bf16(
        make_params(k_par, n_input, n_enc_1, n_enc_2, n_z, att_hidden))

    x = jax.random.normal(k_x, (N, n_input), dtype=jnp.float32)

    # Deterministic row-normalized adjacency (self-loops + random symmetric).
    a = jax.random.uniform(k_adj, (N, N), dtype=jnp.float32)
    a = 0.5 * (a + a.T) + jnp.eye(N, dtype=jnp.float32)
    adj = a / jnp.sum(a, axis=1, keepdims=True)

    # Synthetic DDI edge list + labels (stand-in for load_adj(adj_file)).
    edge_array = jax.random.randint(k_edge, (num_pairs, 2), 0, N, dtype=jnp.int32)
    labels = jax.random.randint(k_lab, (num_pairs,), 0, 2, dtype=jnp.int32)

    outs = dm_ddi_forward(params, x, adj, edge_array, labels)
    outs = jax.block_until_ready(outs)

    emb1, att1, x_bar, C1, C2, y_tr, y_te = outs
    assert emb1.shape == (N, n_z)
    assert att1.shape == (N, 2, 1)
    assert x_bar.shape == (N, n_input)
    assert C1.shape == (16, n_z) and C2.shape == (4, n_z)
    assert y_tr.shape == (16,) and y_te.shape == (4,)

    print("KERNEL_OK")
</pallas_src>

<mosaic_0001>
module attributes {stable_mosaic.version = 11 : i64} {
  func.func @_matmul_kernel(%arg0: i32, %arg1: i32, %arg2: i32, %arg3: memref<16x64xbf16, #tpu.memory_space<vmem>>, %arg4: memref<64x32xbf16, #tpu.memory_space<vmem>>, %arg5: memref<1x32xf32, #tpu.memory_space<vmem>>, %arg6: memref<16x32xbf16, #tpu.memory_space<vmem>>, %arg7: memref<16x32xf32, #tpu.memory_space<vmem>>) attributes {dimension_semantics = [#tpu.dimension_semantics<parallel>, #tpu.dimension_semantics<parallel>, #tpu.dimension_semantics<arbitrary>], iteration_bounds = array<i64: 1, 1, 1>, scalar_prefetch = 0 : i64, scratch_operands = 1 : i64, tpu.core_type = #tpu.core_type<tc>, window_params = [{transform_indices = @transform_0, window_bounds = array<i64: 16, 64>}, {transform_indices = @transform_1, window_bounds = array<i64: 64, 32>}, {transform_indices = @transform_2, window_bounds = array<i64: 1, 32>}, {transform_indices = @transform_3, window_bounds = array<i64: 16, 32>}]} {
    %c0_i32 = arith.constant 0 : i32
    %0 = arith.cmpi eq, %arg2, %c0_i32 : i32
    %1 = arith.extui %0 : i1 to i32
    %c0_i32_0 = arith.constant 0 : i32
    %2 = arith.cmpi ne, %1, %c0_i32_0 : i32
    scf.if %2 {
      %cst_10 = arith.constant 0.000000e+00 : f32
      %12 = vector.broadcast %cst_10 : f32 to vector<16x32xf32>
      %c0_11 = arith.constant 0 : index
      %c0_12 = arith.constant 0 : index
      %13 = vector.load %arg7[%c0_11, %c0_12] : memref<16x32xf32, #tpu.memory_space<vmem>>, vector<16x32xf32>
      tpu.vector_store %arg7[%c0_11, %c0_12], %12 {strides = array<i32>} : memref<16x32xf32, #tpu.memory_space<vmem>>, vector<16x32xf32>,
    } else {
    }
    %c0 = arith.constant 0 : index
    %c0_1 = arith.constant 0 : index
    %3 = vector.load %arg7[%c0, %c0_1] : memref<16x32xf32, #tpu.memory_space<vmem>>, vector<16x32xf32>
    %c0_2 = arith.constant 0 : index
    %c0_3 = arith.constant 0 : index
    %4 = vector.load %arg3[%c0_2, %c0_3] : memref<16x64xbf16, #tpu.memory_space<vmem>>, vector<16x64xbf16>
    %c0_4 = arith.constant 0 : index
    %c0_5 = arith.constant 0 : index
    %5 = vector.load %arg4[%c0_4, %c0_5] : memref<64x32xbf16, #tpu.memory_space<vmem>>, vector<64x32xbf16>
    %cst = arith.constant dense<0.000000e+00> : vector<16x32xf32>
    %6 = tpu.matmul %4, %5, %cst {dimension_numbers = #tpu.dot_dimension_numbers<[1], [0], [0], [1], [0, 0, 1, 1], [], []>} : vector<16x64xbf16>, vector<64x32xbf16>, vector<16x32xf32> -> vector<16x32xf32>
    %7 = arith.addf %3, %6 : vector<16x32xf32>
    %c0_6 = arith.constant 0 : index
    %c0_7 = arith.constant 0 : index
    %8 = vector.load %arg7[%c0_6, %c0_7] : memref<16x32xf32, #tpu.memory_space<vmem>>, vector<16x32xf32>
    tpu.vector_store %arg7[%c0_6, %c0_7], %7 {strides = array<i32>} : memref<16x32xf32, #tpu.memory_space<vmem>>, vector<16x32xf32>,
    %c0_i32_8 = arith.constant 0 : i32
    %9 = arith.cmpi eq, %arg2, %c0_i32_8 : i32
    %10 = arith.extui %9 : i1 to i32
    %c0_i32_9 = arith.constant 0 : i32
    %11 = arith.cmpi ne, %10, %c0_i32_9 : i32
    scf.if %11 {
      %c0_10 = arith.constant 0 : index
      %c0_11 = arith.constant 0 : index
      %12 = vector.load %arg7[%c0_10, %c0_11] : memref<16x32xf32, #tpu.memory_space<vmem>>, vector<16x32xf32>
      %c0_12 = arith.constant 0 : index
      %c0_13 = arith.constant 0 : index
      %13 = vector.load %arg5[%c0_12, %c0_13] : memref<1x32xf32, #tpu.memory_space<vmem>>, vector<1x32xf32>
      %14 = vector.broadcast %13 : vector<1x32xf32> to vector<16x32xf32>
      %15 = arith.addf %12, %14 : vector<16x32xf32>
      %cst_14 = arith.constant 0.000000e+00 : f32
      %16 = vector.broadcast %cst_14 : f32 to vector<16x32xf32>
      %17 = arith.maximumf %15, %16 : vector<16x32xf32>
      %18 = arith.truncf %17 : vector<16x32xf32> to vector<16x32xbf16>
      %c0_15 = arith.constant 0 : index
      %c0_16 = arith.constant 0 : index
      %19 = vector.load %arg6[%c0_15, %c0_16] : memref<16x32xbf16, #tpu.memory_space<vmem>>, vector<16x32xbf16>
      tpu.vector_store %arg6[%c0_15, %c0_16], %18 {strides = array<i32>} : memref<16x32xbf16, #tpu.memory_space<vmem>>, vector<16x32xbf16>,
    } else {
    }
    return
  }
  func.func @transform_0(%arg0: i32, %arg1: i32, %arg2: i32) -> (i32, i32) {
    %c0_i32 = arith.constant 0 : i32
    return %arg0, %arg2 : i32, i32
  }
  func.func @transform_1(%arg0: i32, %arg1: i32, %arg2: i32) -> (i32, i32) {
    %c0_i32 = arith.constant 0 : i32
    return %arg2, %arg1 : i32, i32
  }
  func.func @transform_2(%arg0: i32, %arg1: i32, %arg2: i32) -> (i32, i32) {
    %c0_i32 = arith.constant 0 : i32
    %c0_i32_0 = arith.constant 0 : i32
    return %c0_i32, %arg1 : i32, i32
  }
  func.func @transform_3(%arg0: i32, %arg1: i32, %arg2: i32) -> (i32, i32) {
    %c0_i32 = arith.constant 0 : i32
    return %arg0, %arg1 : i32, i32
  }
}

</mosaic_0001>

<bundles_post_ra>
// kernel: tpu_custom_call.1
= control target key start
LH: loop header
LB: loop body
LE: loop exit
PB: predicated region body
PF: predicated region fallthrough
CT: control target
= control target key end

     0   :  { %v217_v1 = vmov 0.0   ;;  %vm218_vm0 = vmmov 0   ;;  %vm20_vm1 = vcmask 261120   ;;  %s267_s0 = inlined_call_operand.vmem [shape: bf16[16,64], index: 0, kind: input, shape index: {}]   ;;  %s268_s1 = inlined_call_operand.vmem [shape: bf16[64,32], index: 1, kind: input, shape index: {}]   ;;  %s269_s2 = inlined_call_operand.vmem [shape: f32[1,32], index: 2, kind: input, shape index: {}]   ;;  %s270_s3 = inlined_call_operand.hbm [shape: bf16[16,32], index: 3, kind: output, shape index: {}]  }
   0x1   :  { %v190_v0 = vld [vmem:[%s268_s1 + $0x18] sm:$0xff]   ;;  %173 = vmatprep.subr.bf16.mxu0 %v217_v1  ;;  %v191_v2 = vld [vmem:[%s268_s1 + $0x10] sm:$0xff]   ;;  %181 = vmatprep.mubr.msk.bf16.mxu0 %vm218_vm0, %v217_v1  ;;  %21 = vst.msk [vmem:[#allocation2] sm:$0xff] %vm20_vm1, %v217_v1  ;;  %22 = vst.msk [vmem:[#allocation2 + $0x8] sm:$0xff] %vm20_vm1, %v217_v1 }
   0x2   :  { %174 = vmatpush3.bf16.msra.mxu0 %v190_v0 }
   0x3   :  { %175 = vmatprep.subr.bf16.mxu0 %v217_v1 }
   0x4   :  { %8 = vsyncpa [#allocation4], 0  ;;  %v192_v3 = vld [vmem:[%s268_s1 + $0x8] sm:$0xff]   ;;  %v193_v4 = vld [vmem:[%s268_s1] sm:$0xff]   ;;  %vm64_vm2 = vcmask 523264   ;;  %vm138_vm3 = vcmask 257024  }
   0x5   :  { %v194_v5 = vld [vmem:[%s267_s0] sm:$0xff]   ;;  %s219_s0 = smov [#allocation3]  }
   0x6   :  { %176 = vmatpush3.bf16.msra.mxu0 %v191_v2  ;;  %v163_v14 = vld [vmem:[%s269_s2] ss:$0 sm:$0xff]  ;;  %s146_s23 = sshll.u32 %s219_s0, 4  ;;  %s147_s23 = int_to_ptr.vmem [resolvable:$true] %s146_s23 }
   0x7   :  { %177 = vmatprep.subr.bf16.mxu0 %v217_v1  ;;  %s195_s24 = scalar_lea.vmem %s147_s23, 128  ;;  %p200_p1 = scmp.lt.s32.totalorder %s147_s23, %s147_s23 }
   0x8   :  { %v23_v6 = vld [vmem:[#allocation2] sm:$0xff]  ;;  %v24_v10 = vld [vmem:[#allocation2 + $0x8] sm:$0xff]  ;;  %p196_p0 = scmp.ne.s32.totalorder %s147_s23, %s195_s24  ;;  %p201_p2 = scmp.lt.s32.totalorder %s195_s24, %s195_s24 }
   0xa   :  { %178 = vmatpush3.bf16.msra.mxu0 %v192_v3  ;;  %p202_p3 = por %p201_p2, %p200_p1 }
   0xb   :  { %179 = vmatprep.subr.bf16.mxu0 %v217_v1 }
   0xc   :  { %p203_p4 = pnand %p202_p3, %p196_p0 }
   0xe   :  { %180 = vmatpush3.bf16.msra.mxu0 %v193_v4 }
  0x11   :  { %182 = vmatmul.mubr.msk.bf16.vlgmr.msra.gmra.mxu0 %vm64_vm2, %v194_v5 }
  0xd1   :  { %v102_v7 = vpop.f32.mrf.mxu0 }
  0xd2   :  { %v109_v8 = vadd.f32 %v102_v7, %v23_v6 }
  0xd3   :  { %v183_v9 = vpop.f32.mrf.mxu0 }
  0xd4   :  { %112 = vst.msk [vmem:[#allocation2] sm:$0xff] %vm20_vm1, %v109_v8 }
  0xd5   :  { %v105_v11 = vpop.f32.mrf.mxu0 }
  0xd6   :  { %v110_v12 = vadd.f32 %v105_v11, %v24_v10 }
  0xd7   :  { %v184_v13 = vpop.f32.mrf.mxu0 }
  0xd8   :  { %113 = vst.msk [vmem:[#allocation2 + $0x8] sm:$0xff] %vm20_vm1, %v110_v12 }
  0xdb   :  { %v117_v15 = vld [vmem:[#allocation2] sm:$0xff] }
  0xdc   :  { %v126_v16 = vadd.f32 %v163_v14, %v117_v15 }
  0xde   :  { %v128_v17 = vmax.f32 %v126_v16, 0.0 }
  0xdf   :  { %v118_v18 = vld [vmem:[#allocation2 + $0x8] sm:$0xff] }
  0xe0   :  { %v127_v19 = vadd.f32 %v163_v14, %v118_v18  ;;  %v166_v20 = vpack.c.bf16 %v128_v17, %v128_v17 }
  0xe2   :  { %v129_v21 = vmax.f32 %v127_v19, 0.0  ;;  %139 = vst.msk [vmem:[#allocation3] sm:$0xf] %vm138_vm3, %v166_v20 }
  0xe4   :  { %v167_v22 = vpack.c.bf16 %v129_v21, %v129_v21 }
  0xe6   :  { %140 = vst.msk [vmem:[#allocation3 + $0x4] sm:$0xf] %vm138_vm3, %v167_v22 }
  0xe7   :  { %206 = shalt.err (!%p203_p4)
}
  0xe8   :  { %s220_s2 = smov 64   ;;  %s221_s25 = smov 4  }
  0xe9   :  { %152 = dma.vmem_to_hbm [thread:$0]  %s147_s23, 128, %s270_s3, [#allocation4], %s220_s2, %s220_s2, %s221_s25  }
  0xea   :  { %215 = dma.done.wait [#allocation4], 128  }
  0xeb   :  { %216 = vsyncadd [#allocation4], 4294967168 }
  0xec   :  { %156 = vsyncpa [#allocation4], 1 }

</bundles_post_ra>
